<compile_context>
chip_gen: v7x
topology: tpu7x:2x2x1
jax: 0.10.0
libtpu: 0.0.40
codegen_flags: <defaults>
</compile_context>

<pallas_src>
import functools

import jax
import jax.numpy as jnp
from jax.experimental import pallas as pl
from jax.experimental.pallas import tpu as pltpu


def _flash_fwd_kernel(qt_ref, k_ref, vt_ref, ot_ref, m_sc, l_sc, acc_sc, *, scale):
    """Online-softmax flash forward in a 'transposed' (lane-dense) layout.

    qt_ref : (1, D,  tq)   K^T-side of Q   (head_dim on sublanes, seq on lanes)
    k_ref  : (1, tk, D)
    vt_ref : (1, D,  tk)
    ot_ref : (1, D,  tq)   output, written once at the last kv step
    grid   : (BH, num_q_tiles, num_kv_tiles) -- kv innermost reduction axis.
    """
    kv = pl.program_id(2)

    @pl.when(kv == 0)
    def _():
        m_sc[...] = jnp.full_like(m_sc, -jnp.inf)
        l_sc[...] = jnp.zeros_like(l_sc)
        acc_sc[...] = jnp.zeros_like(acc_sc)

    qt = qt_ref[0]          # (D, tq)  -- kept in input dtype (bf16 fast path)
    k = k_ref[0]            # (tk, D)
    vt = vt_ref[0]          # (D, tk)

    # Fold the 1/sqrt(D) scale into Q (tq*D mults instead of tq*tk on scores).
    qt_scaled = qt * scale

    # s_t[j, i] = sum_d k[j, d] * q[i, d] * scale  -> (tk, tq), f32 accumulation.
    s_t = jnp.dot(k, qt_scaled, preferred_element_type=jnp.float32)

    m_prev = m_sc[...]                                       # (1, tq)
    m_new = jnp.maximum(m_prev, s_t.max(axis=0, keepdims=True))
    alpha = jnp.exp(m_prev - m_new)                          # (1, tq)
    p_t = jnp.exp(s_t - m_new)                               # (tk, tq) f32

    l_sc[...] = alpha * l_sc[...] + p_t.sum(axis=0, keepdims=True)
    # PV matmul with operands in the input dtype, f32 accumulation:
    # acc[d, i] += sum_j v[j, d] * p[i, j]
    acc_sc[...] = alpha * acc_sc[...] + jnp.dot(
        vt, p_t.astype(vt.dtype), preferred_element_type=jnp.float32)
    m_sc[...] = m_new

    @pl.when(kv == pl.num_programs(2) - 1)
    def _():
        inv_l = pl.reciprocal(l_sc[...], approx=True)        # EUP, ~free
        ot_ref[0] = (acc_sc[...] * inv_l).astype(ot_ref.dtype)


def flash_attention(q, k, v, mask=None, *, tq=256, tk=256,
                    vmem_limit_bytes=32 * 1024 * 1024):
    """Pallas equivalent of F.scaled_dot_product_attention(q, k, v).

    q, k, v: (batch, heads, seq, head_dim).  Returns same shape/dtype as q.
    """
    # TODO(synk): the optional attention `mask` argument of the torch module is
    # not wired into the kernel; only the mask=None path is implemented.
    assert mask is None, "mask is not supported in this kernel"

    B, H, Sq, D = q.shape
    _, _, Sk, _ = k.shape
    BH = B * H

    # Lane-dense layout: head_dim on sublanes, seq on lanes.
    qt = jnp.transpose(q.reshape(BH, Sq, D), (0, 2, 1))   # (BH, D, Sq)
    k3 = k.reshape(BH, Sk, D)                             # (BH, Sk, D)
    vt = jnp.transpose(v.reshape(BH, Sk, D), (0, 2, 1))   # (BH, D, Sk)

    tq = min(tq, Sq)
    tk = min(tk, Sk)
    assert Sq % tq == 0 and Sk % tk == 0, "seq lengths must divide tile sizes"

    scale = float(D) ** -0.5
    kernel = functools.partial(_flash_fwd_kernel, scale=scale)

    grid = (BH, Sq // tq, Sk // tk)

    out_t = pl.pallas_call(
        kernel,
        out_shape=jax.ShapeDtypeStruct((BH, D, Sq), q.dtype),
        grid_spec=pltpu.PrefetchScalarGridSpec(
            num_scalar_prefetch=0,
            grid=grid,
            in_specs=[
                pl.BlockSpec((1, D, tq), lambda b, qi, ki: (b, 0, qi)),
                pl.BlockSpec((1, tk, D), lambda b, qi, ki: (b, ki, 0)),
                pl.BlockSpec((1, D, tk), lambda b, qi, ki: (b, 0, ki)),
            ],
            out_specs=pl.BlockSpec((1, D, tq), lambda b, qi, ki: (b, 0, qi)),
            scratch_shapes=[
                pltpu.VMEM((1, tq), jnp.float32),   # running max m_i
                pltpu.VMEM((1, tq), jnp.float32),   # running sum l_i
                pltpu.VMEM((D, tq), jnp.float32),   # output accumulator
            ],
        ),
        compiler_params=pltpu.CompilerParams(
            dimension_semantics=("parallel", "parallel", "arbitrary"),
            vmem_limit_bytes=vmem_limit_bytes,
        ),
    )(qt, k3, vt)

    # Back to (B, H, Sq, D).
    return jnp.transpose(out_t, (0, 2, 1)).reshape(B, H, Sq, D)


def _reference_attention(q, k, v):
    scale = q.shape[-1] ** -0.5
    s = jnp.einsum("...id,...jd->...ij",
                   q.astype(jnp.float32), k.astype(jnp.float32)) * scale
    p = jax.nn.softmax(s, axis=-1)
    return jnp.einsum("...ij,...jd->...id", p, v.astype(jnp.float32))


def _check(out, ref, atol, rtol, what):
    if not jnp.allclose(out.astype(jnp.float32), ref, atol=atol, rtol=rtol):
        err = jnp.max(jnp.abs(out.astype(jnp.float32) - ref))
        raise AssertionError(f"Pallas attention mismatch ({what}), max err={err}")


if __name__ == "__main__":
    key = jax.random.PRNGKey(0)

    # 1) Small shape consistent with the module's SDPA call: (B, H, S, D).
    B, H, S, D = 2, 4, 8, 32
    kq, kk, kv_, k2 = jax.random.split(key, 4)
    q = jax.random.normal(kq, (B, H, S, D), dtype=jnp.bfloat16)
    k = jax.random.normal(kk, (B, H, S, D), dtype=jnp.bfloat16)
    v = jax.random.normal(kv_, (B, H, S, D), dtype=jnp.bfloat16)

    out = jax.block_until_ready(flash_attention(q, k, v))
    _check(out, _reference_attention(q, k, v), atol=3e-2, rtol=3e-2, what="small")

    # 2) Slightly larger shape to exercise the multi-tile online-softmax path
    #    (grid = (BH, 2, 2)).
    B2, H2, S2, D2 = 1, 2, 256, 32
    kq2, kk2, kv2 = jax.random.split(k2, 3)
    q2 = jax.random.normal(kq2, (B2, H2, S2, D2), dtype=jnp.bfloat16)
    k2_ = jax.random.normal(kk2, (B2, H2, S2, D2), dtype=jnp.bfloat16)
    v2 = jax.random.normal(kv2, (B2, H2, S2, D2), dtype=jnp.bfloat16)

    out2 = jax.block_until_ready(flash_attention(q2, k2_, v2, tq=128, tk=128))
    _check(out2, _reference_attention(q2, k2_, v2), atol=3e-2, rtol=3e-2,
           what="tiled")

    print("KERNEL_OK")
</pallas_src>

<mosaic_0001>
module attributes {stable_mosaic.version = 11 : i64} {
  func.func @_flash_fwd_kernel(%arg0: i32, %arg1: i32, %arg2: i32, %arg3: memref<1x32x8xbf16, #tpu.memory_space<vmem>>, %arg4: memref<1x8x32xbf16, #tpu.memory_space<vmem>>, %arg5: memref<1x32x8xbf16, #tpu.memory_space<vmem>>, %arg6: memref<1x32x8xbf16, #tpu.memory_space<vmem>>, %arg7: memref<1x8xf32, #tpu.memory_space<vmem>>, %arg8: memref<1x8xf32, #tpu.memory_space<vmem>>, %arg9: memref<32x8xf32, #tpu.memory_space<vmem>>) attributes {dimension_semantics = [#tpu.dimension_semantics<parallel>, #tpu.dimension_semantics<parallel>, #tpu.dimension_semantics<arbitrary>], iteration_bounds = array<i64: 8, 1, 1>, scalar_prefetch = 0 : i64, scratch_operands = 3 : i64, tpu.core_type = #tpu.core_type<tc>, window_params = [{transform_indices = @transform_0, window_bounds = array<i64: 1, 32, 8>}, {transform_indices = @transform_1, window_bounds = array<i64: 1, 8, 32>}, {transform_indices = @transform_2, window_bounds = array<i64: 1, 32, 8>}, {transform_indices = @transform_3, window_bounds = array<i64: 1, 32, 8>}]} {
    %c0_i32 = arith.constant 0 : i32
    %0 = arith.cmpi eq, %arg2, %c0_i32 : i32
    %1 = arith.extui %0 : i1 to i32
    %c0_i32_0 = arith.constant 0 : i32
    %2 = arith.cmpi ne, %1, %c0_i32_0 : i32
    scf.if %2 {
      %cst_27 = arith.constant 0xFF800000 : f32
      %38 = vector.broadcast %cst_27 : f32 to vector<1x8xf32>
      %c0_28 = arith.constant 0 : index
      %c0_29 = arith.constant 0 : index
      %39 = vector.load %arg7[%c0_28, %c0_29] : memref<1x8xf32, #tpu.memory_space<vmem>>, vector<1x8xf32>
      tpu.vector_store %arg7[%c0_28, %c0_29], %38 {strides = array<i32>} : memref<1x8xf32, #tpu.memory_space<vmem>>, vector<1x8xf32>,
      %cst_30 = arith.constant 0.000000e+00 : f32
      %40 = vector.broadcast %cst_30 : f32 to vector<1x8xf32>
      %c0_31 = arith.constant 0 : index
      %c0_32 = arith.constant 0 : index
      %41 = vector.load %arg8[%c0_31, %c0_32] : memref<1x8xf32, #tpu.memory_space<vmem>>, vector<1x8xf32>
      tpu.vector_store %arg8[%c0_31, %c0_32], %40 {strides = array<i32>} : memref<1x8xf32, #tpu.memory_space<vmem>>, vector<1x8xf32>,
      %cst_33 = arith.constant 0.000000e+00 : f32
      %42 = vector.broadcast %cst_33 : f32 to vector<32x8xf32>
      %c0_34 = arith.constant 0 : index
      %c0_35 = arith.constant 0 : index
      %43 = vector.load %arg9[%c0_34, %c0_35] : memref<32x8xf32, #tpu.memory_space<vmem>>, vector<32x8xf32>
      tpu.vector_store %arg9[%c0_34, %c0_35], %42 {strides = array<i32>} : memref<32x8xf32, #tpu.memory_space<vmem>>, vector<32x8xf32>,
    } else {
    }
    %c0 = arith.constant 0 : index
    %c0_1 = arith.constant 0 : index
    %c0_2 = arith.constant 0 : index
    %3 = vector.load %arg3[%c0, %c0_1, %c0_2] : memref<1x32x8xbf16, #tpu.memory_space<vmem>>, vector<1x32x8xbf16>
    %4 = vector.shape_cast %3 : vector<1x32x8xbf16> to vector<32x8xbf16>
    %c0_3 = arith.constant 0 : index
    %c0_4 = arith.constant 0 : index
    %c0_5 = arith.constant 0 : index
    %5 = vector.load %arg4[%c0_3, %c0_4, %c0_5] : memref<1x8x32xbf16, #tpu.memory_space<vmem>>, vector<1x8x32xbf16>
    %6 = vector.shape_cast %5 : vector<1x8x32xbf16> to vector<8x32xbf16>
    %c0_6 = arith.constant 0 : index
    %c0_7 = arith.constant 0 : index
    %c0_8 = arith.constant 0 : index
    %7 = vector.load %arg5[%c0_6, %c0_7, %c0_8] : memref<1x32x8xbf16, #tpu.memory_space<vmem>>, vector<1x32x8xbf16>
    %8 = vector.shape_cast %7 : vector<1x32x8xbf16> to vector<32x8xbf16>
    %cst = arith.constant 1.767580e-01 : bf16
    %9 = vector.broadcast %cst : bf16 to vector<32x8xbf16>
    %10 = arith.mulf %4, %9 : vector<32x8xbf16>
    %cst_9 = arith.constant dense<0.000000e+00> : vector<8x8xf32>
    %11 = tpu.matmul %6, %10, %cst_9 {dimension_numbers = #tpu.dot_dimension_numbers<[1], [0], [0], [1], [0, 0, 1, 1], [], []>} : vector<8x32xbf16>, vector<32x8xbf16>, vector<8x8xf32> -> vector<8x8xf32>
    %c0_10 = arith.constant 0 : index
    %c0_11 = arith.constant 0 : index
    %12 = vector.load %arg7[%c0_10, %c0_11] : memref<1x8xf32, #tpu.memory_space<vmem>>, vector<1x8xf32>
    %cst_12 = arith.constant dense<0xFF800000> : vector<8xf32>
    %13 = vector.multi_reduction <maximumf>, %11, %cst_12 [0] : vector<8x8xf32> to vector<8xf32>
    %14 = vector.shape_cast %13 : vector<8xf32> to vector<1x8xf32>
    %15 = arith.maximumf %12, %14 : vector<1x8xf32>
    %16 = arith.subf %12, %15 : vector<1x8xf32>
    %17 = math.exp %16 : vector<1x8xf32>
    %18 = vector.broadcast %15 : vector<1x8xf32> to vector<8x8xf32>
    %19 = arith.subf %11, %18 : vector<8x8xf32>
    %20 = math.exp %19 : vector<8x8xf32>
    %c0_13 = arith.constant 0 : index
    %c0_14 = arith.constant 0 : index
    %21 = vector.load %arg8[%c0_13, %c0_14] : memref<1x8xf32, #tpu.memory_space<vmem>>, vector<1x8xf32>
    %22 = arith.mulf %17, %21 : vector<1x8xf32>
    %cst_15 = arith.constant dense<0.000000e+00> : vector<8xf32>
    %23 = vector.multi_reduction <add>, %20, %cst_15 [0] : vector<8x8xf32> to vector<8xf32>
    %24 = vector.shape_cast %23 : vector<8xf32> to vector<1x8xf32>
    %25 = arith.addf %22, %24 : vector<1x8xf32>
    %c0_16 = arith.constant 0 : index
    %c0_17 = arith.constant 0 : index
    %26 = vector.load %arg8[%c0_16, %c0_17] : memref<1x8xf32, #tpu.memory_space<vmem>>, vector<1x8xf32>
    tpu.vector_store %arg8[%c0_16, %c0_17], %25 {strides = array<i32>} : memref<1x8xf32, #tpu.memory_space<vmem>>, vector<1x8xf32>,
    %c0_18 = arith.constant 0 : index
    %c0_19 = arith.constant 0 : index
    %27 = vector.load %arg9[%c0_18, %c0_19] : memref<32x8xf32, #tpu.memory_space<vmem>>, vector<32x8xf32>
    %28 = vector.broadcast %17 : vector<1x8xf32> to vector<32x8xf32>
    %29 = arith.mulf %28, %27 : vector<32x8xf32>
    %30 = arith.truncf %20 : vector<8x8xf32> to vector<8x8xbf16>
    %cst_20 = arith.constant dense<0.000000e+00> : vector<32x8xf32>
    %31 = tpu.matmul %8, %30, %cst_20 {dimension_numbers = #tpu.dot_dimension_numbers<[1], [0], [0], [1], [0, 0, 1, 1], [], []>} : vector<32x8xbf16>, vector<8x8xbf16>, vector<32x8xf32> -> vector<32x8xf32>
    %32 = arith.addf %29, %31 : vector<32x8xf32>
    %c0_21 = arith.constant 0 : index
    %c0_22 = arith.constant 0 : index
    %33 = vector.load %arg9[%c0_21, %c0_22] : memref<32x8xf32, #tpu.memory_space<vmem>>, vector<32x8xf32>
    tpu.vector_store %arg9[%c0_21, %c0_22], %32 {strides = array<i32>} : memref<32x8xf32, #tpu.memory_space<vmem>>, vector<32x8xf32>,
    %c0_23 = arith.constant 0 : index
    %c0_24 = arith.constant 0 : index
    %34 = vector.load %arg7[%c0_23, %c0_24] : memref<1x8xf32, #tpu.memory_space<vmem>>, vector<1x8xf32>
    tpu.vector_store %arg7[%c0_23, %c0_24], %15 {strides = array<i32>} : memref<1x8xf32, #tpu.memory_space<vmem>>, vector<1x8xf32>,
    %c0_i32_25 = arith.constant 0 : i32
    %35 = arith.cmpi eq, %arg2, %c0_i32_25 : i32
    %36 = arith.extui %35 : i1 to i32
    %c0_i32_26 = arith.constant 0 : i32
    %37 = arith.cmpi ne, %36, %c0_i32_26 : i32
    scf.if %37 {
      %c0_27 = arith.constant 0 : index
      %c0_28 = arith.constant 0 : index
      %38 = vector.load %arg8[%c0_27, %c0_28] : memref<1x8xf32, #tpu.memory_space<vmem>>, vector<1x8xf32>
      %39 = tpu.reciprocal %38 {approx = true} : vector<1x8xf32> -> vector<1x8xf32>
      %c0_29 = arith.constant 0 : index
      %c0_30 = arith.constant 0 : index
      %40 = vector.load %arg9[%c0_29, %c0_30] : memref<32x8xf32, #tpu.memory_space<vmem>>, vector<32x8xf32>
      %41 = vector.broadcast %39 : vector<1x8xf32> to vector<32x8xf32>
      %42 = arith.mulf %40, %41 : vector<32x8xf32>
      %43 = arith.truncf %42 : vector<32x8xf32> to vector<32x8xbf16>
      %c0_31 = arith.constant 0 : index
      %c0_32 = arith.constant 0 : index
      %c0_33 = arith.constant 0 : index
      %44 = vector.load %arg6[%c0_31, %c0_32, %c0_33] : memref<1x32x8xbf16, #tpu.memory_space<vmem>>, vector<1x32x8xbf16>
      %45 = vector.shape_cast %44 : vector<1x32x8xbf16> to vector<32x8xbf16>
      %46 = vector.shape_cast %43 : vector<32x8xbf16> to vector<1x32x8xbf16>
      tpu.vector_store %arg6[%c0_31, %c0_32, %c0_33], %46 {strides = array<i32>} : memref<1x32x8xbf16, #tpu.memory_space<vmem>>, vector<1x32x8xbf16>,
    } else {
    }
    return
  }
  func.func @transform_0(%arg0: i32, %arg1: i32, %arg2: i32) -> (i32, i32, i32) {
    %c0_i32 = arith.constant 0 : i32
    %c0_i32_0 = arith.constant 0 : i32
    return %arg0, %c0_i32, %arg1 : i32, i32, i32
  }
  func.func @transform_1(%arg0: i32, %arg1: i32, %arg2: i32) -> (i32, i32, i32) {
    %c0_i32 = arith.constant 0 : i32
    %c0_i32_0 = arith.constant 0 : i32
    return %arg0, %arg2, %c0_i32 : i32, i32, i32
  }
  func.func @transform_2(%arg0: i32, %arg1: i32, %arg2: i32) -> (i32, i32, i32) {
    %c0_i32 = arith.constant 0 : i32
    %c0_i32_0 = arith.constant 0 : i32
    return %arg0, %c0_i32, %arg2 : i32, i32, i32
  }
  func.func @transform_3(%arg0: i32, %arg1: i32, %arg2: i32) -> (i32, i32, i32) {
    %c0_i32 = arith.constant 0 : i32
    %c0_i32_0 = arith.constant 0 : i32
    return %arg0, %c0_i32, %arg1 : i32, i32, i32
  }
}

</mosaic_0001>

<bundles_post_ra>
// kernel: tpu_custom_call.1
= control target key start
LH: loop header
LB: loop body
LE: loop exit
PB: predicated region body
PF: predicated region fallthrough
CT: control target
= control target key end

     0   :  { %s772_s12 = smov 0   ;;  %s774_s13 = smov 0   ;;  %s836_s0 = inlined_call_operand.vmem [shape: bf16[8,32,8], index: 0, kind: input, shape index: {}]   ;;  %s837_s1 = inlined_call_operand.vmem [shape: bf16[8,8,32], index: 1, kind: input, shape index: {}]   ;;  %s838_s2 = inlined_call_operand.vmem [shape: bf16[8,32,8], index: 2, kind: input, shape index: {}]   ;;  %s839_s3 = inlined_call_operand.vmem [shape: bf16[8,32,8], index: 3, kind: output, shape index: {}]  }
   0x1   :  { %s776_s14 = smov 0  }
   0x2 LB: > { %s32_s15 = sadd.s32 1, %s743_s13  ;;  %p641_p0 = scmp.ge.s32.totalorder %s747_s14, 1  ;;  %s747_s14 = sphi %s776_s14, %s13_s14   ;;  %s743_s13 = sphi %s774_s13, %s841_s13   ;;  %s739_s12 = sphi %s772_s12, %s840_s12  }
   0x3   : > { %p34_p1 = scmp.ge.s32.totalorder %s32_s15, 8  ;;  %p192_p2 = scmp.lt.s32.totalorder %s747_s14, 9 }
   0x5   : > { %s843_s15 = smov (%p34_p1, %s32_s15), 0  ;;  %p193_p3 = pnand %p641_p0, %p192_p2 }
   0x6   : > { %p237_p4 = scmp.lt.s32.totalorder (!%p193_p3), %s739_s12, 7  ;;  %vm274_vm0 = vcmask (!%p193_p3), 57344   ;;  %v749_v0 = vmov (!%p193_p3), 0.0   ;;  %vm750_vm1 = vmmov (!%p193_p3), 0   ;;  %vm277_vm2 = vcmask (!%p193_p3), 64512  }
   0x7   : > { %196 = sbr.rel (%p193_p3) target bundleno = 509 (0x1fd), region = 32  ;;  %675 = vmatprep.subr.bf16.mxu0 (!%p193_p3), %v749_v0  ;;  %679 = vmatprep.mubr.msk.bf16.mxu0 (!%p193_p3), %vm750_vm1, %v749_v0  ;;  %276 = vst.msk [vmem:[#allocation3] sm:$0x1] (!%p193_p3), %vm274_vm0, %v749_v0  ;;  %v751_v1 = vmov (!%p193_p3), -inf   ;;  %vm307_vm3 = vcmask (!%p193_p3), 261120   ;;  %v365_v21 = vlaneseq (!%p193_p3)  ;;  %vm416_vm4 = vcmask (!%p193_p3), 1043456  }
   0x8   : > { %275 = vst.msk [vmem:[#allocation2] sm:$0x1] (!%p193_p3), %vm274_vm0, %v751_v1  ;;  %vm513_vm5 = vcmask (!%p193_p3), 60416  }
   0x9   : > { %278 = vst.msk [vmem:[#allocation4] sm:$0xff] (!%p193_p3), %vm277_vm2, %v749_v0  ;;  %279 = vst.msk [vmem:[#allocation4 + $0x8] sm:$0xff] (!%p193_p3), %vm277_vm2, %v749_v0  ;;  %v366_v24 = vshrl.u32 (!%p193_p3), %v365_v21, 7 }
   0xa   : > { %280 = vst.msk [vmem:[#allocation4 + $0x10] sm:$0xff] (!%p193_p3), %vm277_vm2, %v749_v0  ;;  %281 = vst.msk [vmem:[#allocation4 + $0x18] sm:$0xff] (!%p193_p3), %vm277_vm2, %v749_v0 }
   0xb   : > { %v367_v28 = vsub.s32 (!%p193_p3), 0, %v366_v24 }
   0xe   : > { %s845_s12 = smov (!%p237_p4, %s739_s12), 7  ;;  %v373_v46 = vld [vmem:[#allocation3] sm:$0x1] }
   0xf   : > { %s796_s16 = sshll.u32 %s845_s12, 4  ;;  %s644_s20 = sshll.u32 %s845_s12, 2  ;;  %v351_v26 = vld [vmem:[#allocation2] sm:$0x1] }
  0x10   : > { %s244_s19 = scalar_lea.vmem %s836_s0, %s796_s16  ;;  %s251_s23 = scalar_lea.vmem %s837_s1, %s644_s20  ;;  %v385_v53 = vld [vmem:[#allocation4] sm:$0xff]  ;;  %v386_v56 = vld [vmem:[#allocation4 + $0x8] sm:$0xff] }
  0x11   : > { %v282_v2 = vld [vmem:[%s244_s19] sm:$0xf]  ;;  %v283_v3 = vld [vmem:[%s244_s19 + $0x4] sm:$0xf]  ;;  %v284_v4 = vld [vmem:[%s244_s19 + $0x8] sm:$0xf]  ;;  %s809_s26 = scalar_lea.vmem %s838_s2, %s796_s16  ;;  %s267_s29 = scalar_lea.vmem %s839_s3, %s796_s16 }
  0x12   : > { %v291_v5 = vmul.bf16 1043676725, %v282_v2  ;;  %v292_v6 = vmul.bf16 1043676725, %v283_v3  ;;  %v285_v7 = vld [vmem:[%s244_s19 + $0xc] sm:$0xf] }
  0x13   : > { %v293_v8 = vmul.bf16 1043676725, %v284_v4  ;;  %v294_v9 = vmul.bf16 1043676725, %v285_v7  ;;  %v286_v12 = vld [vmem:[%s251_s23] sm:$0xf] }
  0x14   : > { %v649_v10 = vcombine.low %v291_v5, %v292_v6  ;;  %v717_v13 = vld [vmem:[%s809_s26] sm:$0xff]   ;;  %v718_v42 = vld [vmem:[%s809_s26 + $0x8] sm:$0xff]   ;;  %v387_v52 = vld [vmem:[#allocation4 + $0x10] sm:$0xff] }
  0x15   : > { %v650_v11 = vcombine.low %v293_v8, %v294_v9  ;;  %685 = vmatprep.mubr.msk.bf16.mxu1 %vm277_vm2, %v717_v13  ;;  %v388_v54 = vld [vmem:[#allocation4 + $0x18] sm:$0xff] }
  0x16   : > { %676 = vmatpush3.bf16.msra.mxu0 %v649_v10 }
  0x17   : > { %677 = vmatprep.subr.bf16.mxu0 %v749_v0 }
  0x1a   : > { %678 = vmatpush3.bf16.msra.mxu0 %v650_v11 }
  0x1d   : > { %680 = vmatmul.mubr.msk.bf16.vlgmr.msra.gmra.mrb[0].mxu0 %vm307_vm3, %v286_v12 }
  0xf0   : > { %v345_v14 = vpop.f32.mrb[0].mxu0 }
  0xf1   : > { %v353_v15 = vsel %vm277_vm2, %v345_v14, -inf  ;;  %v681_v16 = vpop.f32.mrb[1].mxu0 }
  0xf2   : > { %v354_v17 = vrot.slane %v353_v15, 4  ;;  %v348_v18 = vpop.f32.mrb[2].mxu0 }
  0xf3   : > { %v682_v19 = vpop.f32.mrb[3].mxu0 }
  0xf4   : > { %v355_v20 = vmax.f32 %v353_v15, %v354_v17 }
  0xf6   : > { %v356_v22 = vrot.slane %v355_v20, 2 }
  0xf8   : > { %v357_v23 = vmax.f32 %v355_v20, %v356_v22 }
  0xfa   : > { %v358_v25 = vrot.slane %v357_v23, 1 }
  0xfc   : > { %v359_v27 = vmax.f32 %v357_v23, %v358_v25 }
  0xfe   : > { %v360_v29 = vmax.f32 %v351_v26, %v359_v27 }
 0x100   : > { %v361_v30 = vsub.f32 %v351_v26, %v360_v29  ;;  %v368_v31 = vrot.slane %v360_v29, %v367_v28  ;;  %477 = vst.msk [vmem:[#allocation2] sm:$0x1] %vm274_vm0, %v360_v29 }
 0x102   : > { %v362_v32 = vmul.f32 1.442695, %v361_v30  ;;  %v370_v33 = vsub.f32 %v345_v14, %v368_v31 }
 0x104   : > { %719 = vpow2.f32 %v362_v32  ;;  %v371_v34 = vmul.f32 1.442695, %v370_v33 }
 0x106   : > { %721 = vpow2.f32 %v371_v34 }
 0x10e   : > { %v720_v35 = vpop.eup %719 }
 0x10f   : > { %v393_v36 = vrot.slane %v720_v35, %v367_v28  ;;  %v374_v48 = vmul.f32 %v720_v35, %v373_v46 }
 0x110   : > { %v722_v37 = vpop.eup %721 }
 0x111   : > { %v375_v38 = vsel %vm277_vm2, %v722_v37, 0.0  ;;  %v399_v39 = vpack.c.bf16 %v722_v37, %v722_v37  ;;  %v397_v55 = vmul.f32 %v393_v36, %v387_v52  ;;  %v395_v58 = vmul.f32 %v393_v36, %v385_v53 }
 0x112   : > { %v376_v40 = vrot.slane %v375_v38, 4  ;;  %v398_v61 = vmul.f32 %v393_v36, %v388_v54  ;;  %v396_v0 = vmul.f32 %v393_v36, %v386_v56 }
 0x113   : > { %689 = vmatprep.subr.msk.bf16.mxu1 %vm416_vm4, %v399_v39  ;;  %v418_v41 = vsel %vm416_vm4, %v399_v39, 0 }
 0x114   : > { %v377_v43 = vadd.f32 %v376_v40, %v375_v38  ;;  %684 = vmatpush3.bf16.msra.mxu1 %v418_v41 }
 0x116   : > { %v378_v44 = vrot.slane %v377_v43, 2 }
 0x117   : > { %686 = vmatmul.mubr.msk.bf16.vlgmr.msra.gmra.mrb[0].mxu1 %vm277_vm2, %v718_v42 }
 0x118   : > { %v379_v45 = vadd.f32 %v378_v44, %v377_v43 }
 0x11a   : > { %v380_v47 = vrot.slane %v379_v45, 1 }
 0x11c   : > { %v381_v49 = vadd.f32 %v380_v47, %v379_v45 }
 0x11e   : > { %v382_v50 = vadd.f32 %v381_v49, %v374_v48 }
 0x120   : > { %384 = vst.msk [vmem:[#allocation3] sm:$0x1] %vm274_vm0, %v382_v50 }
 0x127   : > { %v481_v51 = vld [vmem:[#allocation3] sm:$0x1] }
 0x128   : > { %723 = vrcp.f32 %v481_v51 }
 0x132   : > { %v724_v4 = vpop.eup %723 }
 0x133   : > { %v491_v5 = vrot.slane %v724_v4, %v367_v28 }
 0x1ea   : > { %v687_v57 = vpop.f32.mrb[0].mxu1 }
 0x1eb   : > { %v471_v59 = vadd.f32 %v687_v57, %v397_v55  ;;  %v454_v60 = vpop.f32.mrb[1].mxu1 }
 0x1ec   : > { %v469_v62 = vadd.f32 %v454_v60, %v395_v58  ;;  %v688_v63 = vpop.f32.mrb[2].mxu1 }
 0x1ed   : > { %475 = vst.msk [vmem:[#allocation4 + $0x10] sm:$0xff] %vm277_vm2, %v471_v59  ;;  %v472_v1 = vadd.f32 %v688_v63, %v398_v61  ;;  %v457_v2 = vpop.f32.mrb[3].mxu1 }
 0x1ee   : > { %473 = vst.msk [vmem:[#allocation4] sm:$0xff] %vm277_vm2, %v469_v62  ;;  %v470_v3 = vadd.f32 %v457_v2, %v396_v0 }
 0x1ef   : > { %476 = vst.msk [vmem:[#allocation4 + $0x18] sm:$0xff] %vm277_vm2, %v472_v1 }
 0x1f0   : > { %474 = vst.msk [vmem:[#allocation4 + $0x8] sm:$0xff] %vm277_vm2, %v470_v3 }
 0x1f4   : > { %v485_v6 = vld [vmem:[#allocation4 + $0x10] sm:$0xff] }
 0x1f5   : > { %v495_v7 = vmul.f32 %v491_v5, %v485_v6  ;;  %v483_v8 = vld [vmem:[#allocation4] sm:$0xff] }
 0x1f6   : > { %v493_v9 = vmul.f32 %v491_v5, %v483_v8  ;;  %v486_v10 = vld [vmem:[#allocation4 + $0x18] sm:$0xff] }
 0x1f7   : > { %v667_v11 = vpack.c.bf16 %v495_v7, %v495_v7  ;;  %v496_v12 = vmul.f32 %v491_v5, %v486_v10  ;;  %v484_v13 = vld [vmem:[#allocation4 + $0x8] sm:$0xff] }
 0x1f8   : > { %v665_v14 = vpack.c.bf16 %v493_v9, %v493_v9  ;;  %v494_v15 = vmul.f32 %v491_v5, %v484_v13 }
 0x1f9   : > { %516 = vst.msk [vmem:[%s267_s29 + $0x8] sm:$0xf] %vm513_vm5, %v667_v11  ;;  %v668_v16 = vpack.c.bf16 %v496_v12, %v496_v12 }
 0x1fa   : > { %514 = vst.msk [vmem:[%s267_s29] sm:$0xf] %vm513_vm5, %v665_v14  ;;  %v666_v17 = vpack.c.bf16 %v494_v15, %v494_v15 }
 0x1fb   : > { %517 = vst.msk [vmem:[%s267_s29 + $0xc] sm:$0xf] %vm513_vm5, %v668_v16 }
 0x1fc   : > { %515 = vst.msk [vmem:[%s267_s29 + $0x4] sm:$0xf] %vm513_vm5, %v666_v17 }
 0x1fd PF: > { %s13_s14 = sadd.s32 1, %s747_s14   ;;  %s840_s12 = smov %s743_s13 }
 0x1fe   : > { %p10_p5 = scmp.ge.s32.totalorder %s13_s14, 10   ;;  %s841_s13 = smov %s843_s15 }
 0x200   :  { %12 = sbr.rel (!%p10_p5) target bundleno = 2 (0x2), region = 76 }

</bundles_post_ra>
